<compile_context>
chip_gen: v7x
topology: tpu7x:2x2x1
jax: 0.10.0
libtpu: 0.0.40
codegen_flags: <defaults>
</compile_context>

<pallas_src>
import jax
import jax.numpy as jnp
from jax import lax
from jax.experimental import pallas as pl
from jax.experimental.pallas import tpu as pltpu


def _critic_kernel(x_ref, w2_ref, aux_ref, b3_ref, o_ref):
    """x_ref:   (B, n_obs)        VMEM
       w2_ref:  (H, H)            VMEM  [pre-transposed W2]
       aux_ref: (n_obs + 3, H)    VMEM  [rows 0..n_obs-1 = W1^T, then b1, b2, w3-row]
       b3_ref:  (1,)              SMEM  scalar bias of the output layer
       o_ref:   (B, 1)            VMEM"""
    eps = 1e-5          # F.layer_norm default eps
    slope = 0.01        # F.leaky_relu default negative_slope

    B, n_obs = x_ref.shape
    H = w2_ref.shape[0]
    n = float(B * H)    # static whole-tensor element count

    # Static views into the packed parameter tile (one DMA descriptor total).
    w1_t = aux_ref[0:n_obs, :]              # (n_obs, H)
    b1 = aux_ref[n_obs:n_obs + 1, :]        # (1, H)
    b2 = aux_ref[n_obs + 1:n_obs + 2, :]    # (1, H)
    w3_row = aux_ref[n_obs + 2:n_obs + 3, :]  # (1, H)

    # ---- fc_layer ----
    h = jnp.dot(x_ref[...], w1_t, preferred_element_type=jnp.float32) + b1

    # ---- whole-tensor layernorm (centered two-pass variance) + leaky_relu ----
    m = jnp.sum(h) / n
    d = h - m
    v = jnp.sum(d * d) / n
    h = d * lax.rsqrt(v + eps)
    h = jnp.maximum(h, slope * h)

    # ---- hidden_layer ----
    # (b2 broadcast add; a stride-0 sublane load only matters once B is large)
    h = jnp.dot(h, w2_ref[...], preferred_element_type=jnp.float32) + b2

    # ---- whole-tensor layernorm + leaky_relu ----
    m = jnp.sum(h) / n
    d = h - m
    v = jnp.sum(d * d) / n
    h = d * lax.rsqrt(v + eps)
    h = jnp.maximum(h, slope * h)

    # ---- linear_layer as VPU mul + XLU lane reduce (no N=1 MXU pass) ----
    out = jnp.sum(h * w3_row, axis=-1, keepdims=True) + b3_ref[0]
    # (B,1) masked store is a single vst at B=8; make lane-dense when batching.
    o_ref[...] = out.astype(o_ref.dtype)


def pack_critic_params(w1, b1, w2, b2, w3, b3):
    """One-time packing of nn.Linear params. Call ONCE (outside the per-step
    path); only x flows through critic_forward per call.
      w1 (H, n_obs), b1 (H,), w2 (H, H), b2 (H,), w3 (1, H), b3 (1,)."""
    f32 = jnp.float32
    H = w1.shape[0]
    aux = jnp.concatenate(
        [w1.T.astype(f32),                 # (n_obs, H)
         b1.reshape(1, H).astype(f32),     # b1 row
         b2.reshape(1, H).astype(f32),     # b2 row
         w3.reshape(1, H).astype(f32)],    # w3 row
        axis=0)                            # (n_obs+3, H) -> pads to 16 sublanes
    w2_t = w2.T.astype(f32)                # (H, H)
    b3_s = b3.reshape(1).astype(f32)       # (1,) -> 4-byte SMEM operand
    return aux, w2_t, b3_s


@jax.jit
def critic_forward(x, aux, w2_t, b3_s):
    """x: (B, n_obs) f32. aux/w2_t/b3_s from pack_critic_params. Returns (B, 1)."""
    B = x.shape[0]
    vmem = pl.BlockSpec(memory_space=pltpu.MemorySpace.VMEM)
    smem = pl.BlockSpec(memory_space=pltpu.MemorySpace.SMEM)
    return pl.pallas_call(
        _critic_kernel,
        out_shape=jax.ShapeDtypeStruct((B, 1), jnp.float32),
        in_specs=[vmem, vmem, vmem, smem],
        out_specs=vmem,
    )(x.astype(jnp.float32), w2_t, aux, b3_s)


def _sparse_init(key, out_features, in_features, sparsity=0.9, std=0.01):
    """Deterministic stand-in for torch.nn.init.sparse_: ~(1-sparsity) of the
    entries are nonzero, drawn from N(0, std)."""
    k_val, k_mask = jax.random.split(key)
    w = jax.random.normal(k_val, (out_features, in_features), jnp.float32) * std
    keep = jax.random.bernoulli(k_mask, 1.0 - sparsity, (out_features, in_features))
    return jnp.where(keep, w, 0.0)


def _reference_forward(x, w1, b1, w2, b2, w3, b3):
    """Pure-JAX reference matching the PyTorch forward semantics exactly."""
    eps, slope = 1e-5, 0.01

    def whole_tensor_layernorm(h):
        m = jnp.mean(h)
        v = jnp.mean((h - m) ** 2)
        return (h - m) / jnp.sqrt(v + eps)

    h = x @ w1.T + b1
    h = whole_tensor_layernorm(h)
    h = jnp.where(h > 0, h, slope * h)
    h = h @ w2.T + b2
    h = whole_tensor_layernorm(h)
    h = jnp.where(h > 0, h, slope * h)
    return h @ w3.T + b3


if __name__ == "__main__":
    n_obs, hidden, batch = 11, 128, 8

    key = jax.random.PRNGKey(0)
    kx, k1, k2, k3 = jax.random.split(key, 4)

    x = jax.random.normal(kx, (batch, n_obs), jnp.float32)

    # Parameters in nn.Linear layout; biases initialized to 0 as in the module.
    w1 = _sparse_init(k1, hidden, n_obs)     # (hidden, n_obs)
    w2 = _sparse_init(k2, hidden, hidden)    # (hidden, hidden)
    w3 = _sparse_init(k3, 1, hidden)         # (1, hidden)
    b1 = jnp.zeros((hidden,), jnp.float32)
    b2 = jnp.zeros((hidden,), jnp.float32)
    b3 = jnp.zeros((1,), jnp.float32)

    # One-time packing; only x flows through the per-step call below.
    aux, w2_t, b3_s = pack_critic_params(w1, b1, w2, b2, w3, b3)

    out = critic_forward(x, aux, w2_t, b3_s)
    out = jax.block_until_ready(out)

    ref = _reference_forward(x, w1, b1, w2, b2, w3, b3)
    assert out.shape == (batch, 1)
    assert jnp.allclose(out, ref, atol=1e-5, rtol=1e-4), (out, ref)

    print("KERNEL_OK")
</pallas_src>

<mosaic_0001>
module attributes {stable_mosaic.version = 11 : i64} {
  func.func @_critic_kernel(%arg0: memref<8x11xf32, #tpu.memory_space<vmem>>, %arg1: memref<128x128xf32, #tpu.memory_space<vmem>>, %arg2: memref<14x128xf32, #tpu.memory_space<vmem>>, %arg3: memref<1xf32, #tpu.memory_space<smem>>, %arg4: memref<8x1xf32, #tpu.memory_space<vmem>>) attributes {dimension_semantics = [], scalar_prefetch = 0 : i64, scratch_operands = 0 : i64, tpu.core_type = #tpu.core_type<tc>} {
    %c0 = arith.constant 0 : index
    %c0_0 = arith.constant 0 : index
    %0 = vector.load %arg2[%c0, %c0_0] : memref<14x128xf32, #tpu.memory_space<vmem>>, vector<11x128xf32>
    %c11 = arith.constant 11 : index
    %c0_1 = arith.constant 0 : index
    %1 = vector.load %arg2[%c11, %c0_1] : memref<14x128xf32, #tpu.memory_space<vmem>>, vector<1x128xf32>
    %c12 = arith.constant 12 : index
    %c0_2 = arith.constant 0 : index
    %2 = vector.load %arg2[%c12, %c0_2] : memref<14x128xf32, #tpu.memory_space<vmem>>, vector<1x128xf32>
    %c13 = arith.constant 13 : index
    %c0_3 = arith.constant 0 : index
    %3 = vector.load %arg2[%c13, %c0_3] : memref<14x128xf32, #tpu.memory_space<vmem>>, vector<1x128xf32>
    %c0_4 = arith.constant 0 : index
    %c0_5 = arith.constant 0 : index
    %4 = vector.load %arg0[%c0_4, %c0_5] : memref<8x11xf32, #tpu.memory_space<vmem>>, vector<8x11xf32>
    %cst = arith.constant dense<0.000000e+00> : vector<8x128xf32>
    %5 = tpu.matmul %4, %0, %cst {dimension_numbers = #tpu.dot_dimension_numbers<[1], [0], [0], [1], [0, 0, 1, 1], [], []>} : vector<8x11xf32>, vector<11x128xf32>, vector<8x128xf32> -> vector<8x128xf32>
    %6 = vector.broadcast %1 : vector<1x128xf32> to vector<8x128xf32>
    %7 = arith.addf %5, %6 : vector<8x128xf32>
    %8 = vector.shape_cast %7 : vector<8x128xf32> to vector<1x8x128xf32>
    %cst_6 = arith.constant dense<0.000000e+00> : vector<1xf32>
    %9 = vector.multi_reduction <add>, %8, %cst_6 [1, 2] : vector<1x8x128xf32> to vector<1xf32>
    %10 = vector.shape_cast %9 : vector<1xf32> to vector<1x1x1xf32>
    %11 = vector.extract %10[0, 0, 0] : f32 from vector<1x1x1xf32>
    %cst_7 = arith.constant 1.024000e+03 : f32
    %12 = arith.divf %11, %cst_7 : f32
    %13 = vector.broadcast %12 : f32 to vector<8x128xf32>
    %14 = arith.subf %7, %13 : vector<8x128xf32>
    %15 = arith.mulf %14, %14 : vector<8x128xf32>
    %16 = vector.shape_cast %15 : vector<8x128xf32> to vector<1x8x128xf32>
    %cst_8 = arith.constant dense<0.000000e+00> : vector<1xf32>
    %17 = vector.multi_reduction <add>, %16, %cst_8 [1, 2] : vector<1x8x128xf32> to vector<1xf32>
    %18 = vector.shape_cast %17 : vector<1xf32> to vector<1x1x1xf32>
    %19 = vector.extract %18[0, 0, 0] : f32 from vector<1x1x1xf32>
    %cst_9 = arith.constant 1.024000e+03 : f32
    %20 = arith.divf %19, %cst_9 : f32
    %cst_10 = arith.constant 9.99999974E-6 : f32
    %21 = arith.addf %20, %cst_10 : f32
    %22 = math.rsqrt %21 : f32
    %23 = vector.broadcast %22 : f32 to vector<8x128xf32>
    %24 = arith.mulf %14, %23 : vector<8x128xf32>
    %cst_11 = arith.constant 0.00999999977 : f32
    %25 = vector.broadcast %cst_11 : f32 to vector<8x128xf32>
    %26 = arith.mulf %25, %24 : vector<8x128xf32>
    %27 = arith.maximumf %24, %26 : vector<8x128xf32>
    %c0_12 = arith.constant 0 : index
    %c0_13 = arith.constant 0 : index
    %28 = vector.load %arg1[%c0_12, %c0_13] : memref<128x128xf32, #tpu.memory_space<vmem>>, vector<128x128xf32>
    %cst_14 = arith.constant dense<0.000000e+00> : vector<8x128xf32>
    %29 = tpu.matmul %27, %28, %cst_14 {dimension_numbers = #tpu.dot_dimension_numbers<[1], [0], [0], [1], [0, 0, 1, 1], [], []>} : vector<8x128xf32>, vector<128x128xf32>, vector<8x128xf32> -> vector<8x128xf32>
    %30 = vector.broadcast %2 : vector<1x128xf32> to vector<8x128xf32>
    %31 = arith.addf %29, %30 : vector<8x128xf32>
    %32 = vector.shape_cast %31 : vector<8x128xf32> to vector<1x8x128xf32>
    %cst_15 = arith.constant dense<0.000000e+00> : vector<1xf32>
    %33 = vector.multi_reduction <add>, %32, %cst_15 [1, 2] : vector<1x8x128xf32> to vector<1xf32>
    %34 = vector.shape_cast %33 : vector<1xf32> to vector<1x1x1xf32>
    %35 = vector.extract %34[0, 0, 0] : f32 from vector<1x1x1xf32>
    %cst_16 = arith.constant 1.024000e+03 : f32
    %36 = arith.divf %35, %cst_16 : f32
    %37 = vector.broadcast %36 : f32 to vector<8x128xf32>
    %38 = arith.subf %31, %37 : vector<8x128xf32>
    %39 = arith.mulf %38, %38 : vector<8x128xf32>
    %40 = vector.shape_cast %39 : vector<8x128xf32> to vector<1x8x128xf32>
    %cst_17 = arith.constant dense<0.000000e+00> : vector<1xf32>
    %41 = vector.multi_reduction <add>, %40, %cst_17 [1, 2] : vector<1x8x128xf32> to vector<1xf32>
    %42 = vector.shape_cast %41 : vector<1xf32> to vector<1x1x1xf32>
    %43 = vector.extract %42[0, 0, 0] : f32 from vector<1x1x1xf32>
    %cst_18 = arith.constant 1.024000e+03 : f32
    %44 = arith.divf %43, %cst_18 : f32
    %cst_19 = arith.constant 9.99999974E-6 : f32
    %45 = arith.addf %44, %cst_19 : f32
    %46 = math.rsqrt %45 : f32
    %47 = vector.broadcast %46 : f32 to vector<8x128xf32>
    %48 = arith.mulf %38, %47 : vector<8x128xf32>
    %cst_20 = arith.constant 0.00999999977 : f32
    %49 = vector.broadcast %cst_20 : f32 to vector<8x128xf32>
    %50 = arith.mulf %49, %48 : vector<8x128xf32>
    %51 = arith.maximumf %48, %50 : vector<8x128xf32>
    %52 = vector.broadcast %3 : vector<1x128xf32> to vector<8x128xf32>
    %53 = arith.mulf %51, %52 : vector<8x128xf32>
    %cst_21 = arith.constant dense<0.000000e+00> : vector<8xf32>
    %54 = vector.multi_reduction <add>, %53, %cst_21 [1] : vector<8x128xf32> to vector<8xf32>
    %55 = vector.shape_cast %54 : vector<8xf32> to vector<8x1xf32>
    %c0_22 = arith.constant 0 : index
    %56 = memref.load %arg3[%c0_22] : memref<1xf32, #tpu.memory_space<smem>>
    %57 = vector.broadcast %56 : f32 to vector<8x1xf32>
    %58 = arith.addf %55, %57 : vector<8x1xf32>
    %c0_23 = arith.constant 0 : index
    %c0_24 = arith.constant 0 : index
    %59 = vector.load %arg4[%c0_23, %c0_24] : memref<8x1xf32, #tpu.memory_space<vmem>>, vector<8x1xf32>
    tpu.vector_store %arg4[%c0_23, %c0_24], %58 {strides = array<i32>} : memref<8x1xf32, #tpu.memory_space<vmem>>, vector<8x1xf32>,
    return
  }
}

</mosaic_0001>

<bundles_post_ra>
// kernel: critic_forward.1
= control target key start
LH: loop header
LB: loop body
LE: loop exit
PB: predicated region body
PF: predicated region fallthrough
CT: control target
= control target key end

     0   :  { %10 = vsyncpa [#allocation4], 0  ;;  %s604_s0 = inlined_call_operand.hbm [shape: f32[8,11], index: 0, kind: input, shape index: {}]   ;;  %s605_s1 = inlined_call_operand.hbm [shape: f32[128,128], index: 1, kind: input, shape index: {}]   ;;  %s606_s2 = inlined_call_operand.hbm [shape: f32[14,128], index: 2, kind: input, shape index: {}]   ;;  %s607_s3 = inlined_call_operand.<no memory space> [shape: f32[1], index: 3, kind: input, shape index: {}]   ;;  %s608_s4 = inlined_call_operand.vmem [shape: f32[8,1], index: 4, kind: output, shape index: {}]  }
   0x1   :  { %11 = vsyncpa [#allocation6], 0  ;;  %s513_s15 = smov [#allocation5]   ;;  %s443_s19 = scalar_lea.hbm %s605_s1, 2048 }
   0x2   :  { %s27_s16 = sshll.u32 %s513_s15, 4  ;;  %p444_p0 = scmp.ne.s32.totalorder %s605_s1, %s443_s19  ;;  %s28_s16 = int_to_ptr.vmem [resolvable:$true] %s27_s16 }
   0x3   :  { %p447_p1 = scmp.lt.u32.totalorder %s443_s19, %s605_s1 }
   0x5   :  { %p449_p2 = pnand %p447_p1, %p444_p0 }
   0x7   :  { %452 = shalt.err (!%p449_p2)
}
   0x8   :  { %s453_s24 = scalar_lea.vmem %s28_s16, 2048  ;;  %p458_p4 = scmp.lt.s32.totalorder %s28_s16, %s28_s16 }
   0x9   :  { %p454_p3 = scmp.ne.s32.totalorder %s28_s16, %s453_s24  ;;  %p459_p5 = scmp.lt.s32.totalorder %s453_s24, %s453_s24 }
   0xb   :  { %p460_p6 = por %p459_p5, %p458_p4 }
   0xd   :  { %p461_p7 = pnand %p460_p6, %p454_p3 }
   0xf   :  { %464 = shalt.err (!%p461_p7)
}
  0x10   :  { %s514_s25 = smov 128   ;;  %s515_s26 = smov 8  }
  0x11   :  { %33 = dma.hbm_to_vmem [thread:$0]  %s605_s1, 2048, %s28_s16, [#allocation6], %s514_s25, %s514_s25, %s515_s26  }
  0x12   :  { %s516_s29 = smov [#allocation3]   ;;  %s517_s5 = smov [#allocation7]  }
  0x13   :  { %s18_s30 = sshll.u32 %s516_s29, 4  ;;  %s39_s6 = sshll.u32 %s517_s5, 4  ;;  %s19_s30 = int_to_ptr.vmem [resolvable:$true] %s18_s30  ;;  %s40_s6 = int_to_ptr.vmem [resolvable:$true] %s39_s6 }
  0x14   :  { %s465_s9 = scalar_lea.hbm %s604_s0, 128 }
  0x15   :  { %p466_p8 = scmp.ne.s32.totalorder %s604_s0, %s465_s9  ;;  %p469_p9 = scmp.lt.u32.totalorder %s465_s9, %s604_s0 }
  0x17   :  { %p471_p10 = pnand %p469_p9, %p466_p8 }
  0x19   :  { %474 = shalt.err (!%p471_p10)
}
  0x1a   :  { %s475_s1 = scalar_lea.vmem %s19_s30, 128  ;;  %p480_p12 = scmp.lt.s32.totalorder %s19_s30, %s19_s30 }
  0x1b   :  { %p476_p11 = scmp.ne.s32.totalorder %s19_s30, %s475_s1  ;;  %p481_p13 = scmp.lt.s32.totalorder %s475_s1, %s475_s1 }
  0x1d   :  { %p482_p0 = por %p481_p13, %p480_p12 }
  0x1f   :  { %p483_p1 = pnand %p482_p0, %p476_p11 }
  0x21   :  { %486 = shalt.err (!%p483_p1)
}
  0x22   :  { %21 = dma.hbm_to_vmem [thread:$0]  %s604_s0, 128, %s19_s30, [#allocation4]  }
  0x23   :  { %s487_s18 = scalar_lea.hbm %s606_s2, 256 }
  0x24   :  { %p488_p2 = scmp.ne.s32.totalorder %s606_s2, %s487_s18  ;;  %p491_p3 = scmp.lt.u32.totalorder %s487_s18, %s606_s2 }
  0x26   :  { %p493_p4 = pnand %p491_p3, %p488_p2 }
  0x28   :  { %496 = shalt.err (!%p493_p4)
}
  0x29   :  { %s497_s23 = scalar_lea.vmem %s40_s6, 256  ;;  %p502_p6 = scmp.lt.s32.totalorder %s40_s6, %s40_s6 }
  0x2a   :  { %p498_p5 = scmp.ne.s32.totalorder %s40_s6, %s497_s23  ;;  %p503_p7 = scmp.lt.s32.totalorder %s497_s23, %s497_s23 }
  0x2c   :  { %p504_p8 = por %p503_p7, %p502_p6 }
  0x2e   :  { %p505_p9 = pnand %p504_p8, %p498_p5 }
  0x30   :  { %508 = shalt.err (!%p505_p9)
}
  0x31   :  { %45 = dma.hbm_to_vmem [thread:$0]  %s606_s2, 256, %s40_s6, [#allocation6], %s514_s25, %s514_s25, %s515_s26  }
  0x32   :  { %509 = dma.done.wait [#allocation4], 128  }
  0x33   :  { %510 = vsyncadd [#allocation4], 4294967168 }
  0x34   :  { %511 = dma.done.wait [#allocation6], 2304  }
  0x35   :  { %512 = vsyncadd [#allocation6], 4294964992  ;;  %v518_v0 = vmov 0.0|0.0   ;;  %vm519_vm0 = vmmov 0   ;;  %v520_v1 = vmov 0.0   ;;  %vm71_vm1 = vcmask 1042432  }
  0x36   :  { %390 = vmatprep.subr.bf16.mxu0 %v518_v0  ;;  %394 = vmatprep.subr.bf16.mxu1 %v518_v0  ;;  %v57_v2 = vld [vmem:[#allocation7] sm:$0xff]  ;;  %v58_v3 = vld [vmem:[#allocation7 + $0x8] sm:$0x7]  ;;  %vm521_vm2 = vmmov 1   ;;  %v62_v5 = vld [vmem:[#allocation3] sm:$0xff]  ;;  %vm67_vm4 = vcmask 89088  }
  0x37   :  { %352 = vmatprep.mubr.msk.f32.mxu0 %vm519_vm0, %v520_v1  ;;  %387 = vmatprep.mubr.msk.f32.mxu1 %vm519_vm0, %v520_v1  ;;  %vm392_vm3 = vmpackc.low %vm71_vm1, %vm521_vm2  ;;  %v391_v4 = vpack.c.bf16 %v58_v3, %v57_v2  ;;  %v323_v6 = vld [vmem:[#allocation7 + $0xb] ss:$0 sm:$0xff]  ;;  %v180_v20 = vld [vmem:[#allocation5] sm:$0xff]  ;;  %vm315_vm5 = vcmask 7168  }
  0x38   :  { %v181_v21 = vld [vmem:[#allocation5 + $0x8] sm:$0xff]  ;;  %v182_v22 = vld [vmem:[#allocation5 + $0x10] sm:$0xff]  ;;  %v183_v24 = vld [vmem:[#allocation5 + $0x18] sm:$0xff] }
  0x39   :  { %393 = vmatpush3.bf16.msk.msra.mxu0 %vm392_vm3, %v391_v4  ;;  %v395_v23 = vpack.c.bf16 %v181_v21, %v180_v20  ;;  %v398_v25 = vpack.c.bf16 %v183_v24, %v182_v22  ;;  %v184_v26 = vld [vmem:[#allocation5 + $0x20] sm:$0xff]  ;;  %v185_v27 = vld [vmem:[#allocation5 + $0x28] sm:$0xff]  ;;  %v186_v29 = vld [vmem:[#allocation5 + $0x30] sm:$0xff]  ;;  %v313_v22 = vstv %s607_s3 }
  0x3a   :  { %v401_v28 = vpack.c.bf16 %v185_v27, %v184_v26  ;;  %v187_v30 = vld [vmem:[#allocation5 + $0x38] sm:$0xff]  ;;  %v188_v32 = vld [vmem:[#allocation5 + $0x40] sm:$0xff]  ;;  %v189_v33 = vld [vmem:[#allocation5 + $0x48] sm:$0xff] }
  0x3b   :  { %396 = vmatpush3.bf16.msra.mxu1 %v395_v23  ;;  %v404_v31 = vpack.c.bf16 %v187_v30, %v186_v29  ;;  %v407_v34 = vpack.c.bf16 %v189_v33, %v188_v32  ;;  %v190_v35 = vld [vmem:[#allocation5 + $0x50] sm:$0xff]  ;;  %v191_v36 = vld [vmem:[#allocation5 + $0x58] sm:$0xff]  ;;  %v192_v38 = vld [vmem:[#allocation5 + $0x60] sm:$0xff] }
  0x3c   :  { %353 = vmatmul.mubr.msk.f32.vlgmr.msra.gmra.mrb[0].mxu0 %vm67_vm4, %v62_v5  ;;  %397 = vmatprep.subr.bf16.mxu1 %v518_v0  ;;  %v410_v37 = vpack.c.bf16 %v191_v36, %v190_v35  ;;  %v193_v39 = vld [vmem:[#allocation5 + $0x68] sm:$0xff]  ;;  %v194_v43 = vld [vmem:[#allocation5 + $0x70] sm:$0xff]  ;;  %v195_v44 = vld [vmem:[#allocation5 + $0x78] sm:$0xff] }
  0x3d   :  { %v413_v40 = vpack.c.bf16 %v193_v39, %v192_v38  ;;  %v416_v46 = vpack.c.bf16 %v195_v44, %v194_v43  ;;  %v326_v57 = vld [vmem:[#allocation7 + $0xc] ss:$0 sm:$0xff] }
  0x3f   :  { %399 = vmatpush3.bf16.msra.mxu1 %v398_v25 }
  0x40   :  { %400 = vmatprep.subr.bf16.mxu1 %v518_v0 }
  0x43   :  { %402 = vmatpush3.bf16.msra.mxu1 %v401_v28 }
  0x44   :  { %403 = vmatprep.subr.bf16.mxu1 %v518_v0 }
  0x47   :  { %405 = vmatpush3.bf16.msra.mxu1 %v404_v31 }
  0x48   :  { %406 = vmatprep.subr.bf16.mxu1 %v518_v0 }
  0x4b   :  { %408 = vmatpush3.bf16.msra.mxu1 %v407_v34 }
  0x4c   :  { %409 = vmatprep.subr.bf16.mxu1 %v518_v0 }
  0x4f   :  { %411 = vmatpush3.bf16.msra.mxu1 %v410_v37 }
  0x50   :  { %412 = vmatprep.subr.bf16.mxu1 %v518_v0 }
  0x53   :  { %414 = vmatpush3.bf16.msra.mxu1 %v413_v40 }
  0x54   :  { %415 = vmatprep.subr.bf16.mxu1 %v518_v0 }
  0x57   :  { %417 = vmatpush3.bf16.msra.mxu1 %v416_v46 }
 0x10f   :  { %v141_v7 = vpop.f32.mrb[0].mxu0 }
 0x110   :  { %v142_v8 = vadd.f32 %v323_v6, %v141_v7  ;;  %v354_v9 = vpop.f32.mrb[1].mxu0 }
 0x112   :  { %145 = vadd.xlane.f32.xlu0 %v142_v8 }
 0x19f   :  { %v146_v10 = vpop.xlane.xlu0 %145 }
 0x1a0   :  { %v147_v11 = vrot.slane %v146_v10, 4 }
 0x1a2   :  { %v148_v12 = vadd.f32 %v147_v11, %v146_v10 }
 0x1a4   :  { %v149_v13 = vrot.slane %v148_v12, 2 }
 0x1a6   :  { %v150_v14 = vadd.f32 %v149_v13, %v148_v12 }
 0x1a8   :  { %v151_v15 = vrot.slane %v150_v14, 1 }
 0x1aa   :  { %v152_v16 = vadd.f32 %v151_v15, %v150_v14 }
 0x1ac   :  { %418 = vpush %v152_v16 }
 0x1dd   :  { %s419_s2 = spop %418 }
 0x1de   :  { %s156_s25 = smul.f32 0.0009765625, %s419_s2 }
 0x1e0   :  { %v157_v17 = vstv %s156_s25 }
 0x1e1   :  { %v158_v18 = vsub.f32 %v142_v8, %v157_v17 }
 0x1e3   :  { %v159_v19 = vmul.f32 %v158_v18, %v158_v18 }
 0x1e5   :  { %160 = vadd.xlane.f32.xlu0 %v159_v19  ;;  %v327_v19 = vld [vmem:[#allocation7 + $0xd] ss:$0 sm:$0xff] }
 0x272   :  { %v161_v41 = vpop.xlane.xlu0 %160 }
 0x273   :  { %v162_v42 = vrot.slane %v161_v41, 4 }
 0x275   :  { %v163_v45 = vadd.f32 %v162_v42, %v161_v41 }
 0x277   :  { %v164_v47 = vrot.slane %v163_v45, 2 }
 0x279   :  { %v165_v48 = vadd.f32 %v164_v47, %v163_v45 }
 0x27b   :  { %v166_v49 = vrot.slane %v165_v48, 1 }
 0x27d   :  { %v167_v50 = vadd.f32 %v166_v49, %v165_v48 }
 0x27f   :  { %420 = vpush %v167_v50 }
 0x2b0   :  { %s421_s26 = spop %420 }
 0x2b1   :  { %s171_s27 = smul.f32 0.0009765625, %s421_s26 }
 0x2b3   :  { %s172_s28 = sadd.f32 1e-05, %s171_s27 }
 0x2b5   :  { %v173_v51 = vstv %s172_s28 }
 0x2b6   :  { %439 = vrsqrt.f32 %v173_v51 }
 0x2c0   :  { %v440_v52 = vpop.eup %439 }
 0x2c1   :  { %422 = vpush %v440_v52 }
 0x2f2   :  { %s423_s29 = spop %422 }
 0x2f3   :  { %v176_v53 = vstv %s423_s29 }
 0x2f4   :  { %v177_v54 = vmul.f32 %v176_v53, %v158_v18 }
 0x2f6   :  { %v178_v55 = vmul.f32 0.01, %v177_v54 }
 0x2f8   :  { %v179_v56 = vmax.f32 %v177_v54, %v178_v55 }
 0x2fa   :  { %388 = vmatmul.mubr.f32.vlgmr.msra.gmra.mrb[0].mxu1 %v179_v56 }
 0x3cd   :  { %v266_v58 = vpop.f32.mrb[0].mxu1 }
 0x3ce   :  { %v267_v59 = vadd.f32 %v326_v57, %v266_v58  ;;  %v389_v60 = vpop.f32.mrb[1].mxu1 }
 0x3d0   :  { %270 = vadd.xlane.f32.xlu1 %v267_v59 }
 0x45d   :  { %v271_v61 = vpop.xlane.xlu1 %270 }
 0x45e   :  { %v272_v62 = vrot.slane %v271_v61, 4 }
 0x460   :  { %v273_v63 = vadd.f32 %v272_v62, %v271_v61 }
 0x462   :  { %v274_v0 = vrot.slane %v273_v63, 2 }
 0x464   :  { %v275_v1 = vadd.f32 %v274_v0, %v273_v63 }
 0x466   :  { %v276_v2 = vrot.slane %v275_v1, 1 }
 0x468   :  { %v277_v3 = vadd.f32 %v276_v2, %v275_v1 }
 0x46a   :  { %424 = vpush %v277_v3 }
 0x49b   :  { %s425_s30 = spop %424 }
 0x49c   :  { %s281_s5 = smul.f32 0.0009765625, %s425_s30 }
 0x49e   :  { %v282_v4 = vstv %s281_s5 }
 0x49f   :  { %v283_v5 = vsub.f32 %v267_v59, %v282_v4 }
 0x4a1   :  { %v284_v6 = vmul.f32 %v283_v5, %v283_v5 }
 0x4a3   :  { %285 = vadd.xlane.f32.xlu1 %v284_v6 }
 0x530   :  { %v286_v7 = vpop.xlane.xlu1 %285 }
 0x531   :  { %v287_v8 = vrot.slane %v286_v7, 4 }
 0x533   :  { %v288_v9 = vadd.f32 %v287_v8, %v286_v7 }
 0x535   :  { %v289_v10 = vrot.slane %v288_v9, 2 }
 0x537   :  { %v290_v11 = vadd.f32 %v289_v10, %v288_v9 }
 0x539   :  { %v291_v12 = vrot.slane %v290_v11, 1 }
 0x53b   :  { %v292_v13 = vadd.f32 %v291_v12, %v290_v11 }
 0x53d   :  { %426 = vpush %v292_v13 }
 0x56e   :  { %s427_s6 = spop %426 }
 0x56f   :  { %s296_s7 = smul.f32 0.0009765625, %s427_s6 }
 0x571   :  { %s297_s8 = sadd.f32 1e-05, %s296_s7 }
 0x573   :  { %v298_v14 = vstv %s297_s8 }
 0x574   :  { %441 = vrsqrt.f32 %v298_v14 }
 0x57e   :  { %v442_v15 = vpop.eup %441 }
 0x57f   :  { %428 = vpush %v442_v15 }
 0x5b0   :  { %s429_s9 = spop %428 }
 0x5b1   :  { %v301_v16 = vstv %s429_s9 }
 0x5b2   :  { %v302_v17 = vmul.f32 %v301_v16, %v283_v5 }
 0x5b4   :  { %v303_v18 = vmul.f32 0.01, %v302_v17 }
 0x5b6   :  { %v304_v20 = vmax.f32 %v302_v17, %v303_v18 }
 0x5b8   :  { %v309_v21 = vmul.f32 %v327_v19, %v304_v20 }
 0x5ba   :  { %310 = vadd.xlane.f32.xlu0 %v309_v21 }
 0x647   :  { %v311_v23 = vpop.xlane.xlu0 %310 }
 0x648   :  { %v314_v24 = vadd.f32 %v313_v22, %v311_v23 }
 0x64a   :  { %316 = vst.msk [vmem:[%s608_s4] sm:$0xff] %vm315_vm5, %v314_v24 }
 0x64b   :  { %321 = vsyncpa [#allocation4], 1 }
 0x64c   :  { %322 = vsyncpa [#allocation6], 1 }

</bundles_post_ra>
